<compile_context>
chip_gen: v6e
topology: v6e:2x2x1
jax: 0.10.0
libtpu: 0.0.40
codegen_flags: <defaults>
</compile_context>

<pallas_src>
import math

import jax
import jax.numpy as jnp
from jax.experimental import pallas as pl
from jax.experimental.pallas import tpu as pltpu

_LANE = 1024      # lane-dense last dim (multiple of 128)
_ROW_TILE = 512   # rows per block: 512*1024*4B = 2 MiB per f32 tile


def _resblock_kernel(x_ref, o_ref):
    # Fused residual + base(x):  o = x + relu(x).
    # Scalar 0.0 avoids materializing a broadcast zeros tile into vregs.
    x = x_ref[...]
    o_ref[...] = x + jnp.maximum(x, 0.0)


@jax.jit
def resblock_forward(x: jax.Array) -> jax.Array:
    """ResBlock forward: x + relu(x), fused in one Pallas elementwise pass.

    x: arbitrary-shape array (e.g. NCHW (B, C, H, W) float32).
    returns: same shape/dtype as x.
    """
    orig_shape = x.shape
    total = math.prod(orig_shape)

    # Flatten to a lane-dense slab; pad so the row-tile grid divides evenly.
    rows = pl.cdiv(total, _LANE)
    if rows > _ROW_TILE:
        rows = pl.cdiv(rows, _ROW_TILE) * _ROW_TILE
        tr = _ROW_TILE
    else:
        tr = rows  # single row-block; block dim == full array dim is allowed
    padded_total = rows * _LANE
    grid_rows = rows // tr

    x_flat = x.reshape(-1)
    if padded_total != total:
        x_flat = jnp.pad(x_flat, (0, padded_total - total))
    x2d = x_flat.reshape(rows, _LANE)

    out2d = pl.pallas_call(
        _resblock_kernel,
        out_shape=jax.ShapeDtypeStruct((rows, _LANE), x.dtype),
        grid=(grid_rows,),
        in_specs=[pl.BlockSpec((tr, _LANE), lambda i: (i, 0))],
        out_specs=pl.BlockSpec((tr, _LANE), lambda i: (i, 0)),
        compiler_params=pltpu.CompilerParams(
            dimension_semantics=("parallel",),
        ),
    )(x2d)

    out_flat = out2d.reshape(-1)
    if padded_total != total:
        out_flat = out_flat[:total]
    return out_flat.reshape(orig_shape)


if __name__ == "__main__":
    key = jax.random.PRNGKey(0)

    # Small NCHW input consistent with the module's forward: (B=2, C=4, H=16, W=16)
    x = jax.random.normal(key, (2, 4, 16, 16), dtype=jnp.float32)
    y = jax.block_until_ready(resblock_forward(x))
    y_ref = x + jnp.maximum(x, 0.0)
    assert y.shape == x.shape and y.dtype == x.dtype
    assert jnp.allclose(y, y_ref), "mismatch vs reference x + relu(x)"

    # Exercise the non-divisible (padding) path with an odd-sized input.
    x_odd = jax.random.normal(jax.random.PRNGKey(1), (2, 3, 5, 7), dtype=jnp.float32)
    y_odd = jax.block_until_ready(resblock_forward(x_odd))
    y_odd_ref = x_odd + jnp.maximum(x_odd, 0.0)
    assert y_odd.shape == x_odd.shape and y_odd.dtype == x_odd.dtype
    assert jnp.allclose(y_odd, y_odd_ref), "mismatch vs reference (odd shape)"

    print("KERNEL_OK")
</pallas_src>

<mosaic_0001>
module attributes {stable_mosaic.version = 11 : i64} {
  func.func @_resblock_kernel(%arg0: i32, %arg1: memref<2x1024xf32, #tpu.memory_space<vmem>>, %arg2: memref<2x1024xf32, #tpu.memory_space<vmem>>) attributes {dimension_semantics = [#tpu.dimension_semantics<parallel>], iteration_bounds = array<i64: 1>, scalar_prefetch = 0 : i64, scratch_operands = 0 : i64, tpu.core_type = #tpu.core_type<tc>, window_params = [{transform_indices = @transform_0, window_bounds = array<i64: 2, 1024>}, {transform_indices = @transform_1, window_bounds = array<i64: 2, 1024>}]} {
    %c0 = arith.constant 0 : index
    %c0_0 = arith.constant 0 : index
    %0 = vector.load %arg1[%c0, %c0_0] : memref<2x1024xf32, #tpu.memory_space<vmem>>, vector<2x1024xf32>
    %cst = arith.constant 0.000000e+00 : f32
    %1 = vector.broadcast %cst : f32 to vector<2x1024xf32>
    %2 = arith.maximumf %0, %1 : vector<2x1024xf32>
    %3 = arith.addf %0, %2 : vector<2x1024xf32>
    %c0_1 = arith.constant 0 : index
    %c0_2 = arith.constant 0 : index
    %4 = vector.load %arg2[%c0_1, %c0_2] : memref<2x1024xf32, #tpu.memory_space<vmem>>, vector<2x1024xf32>
    tpu.vector_store %arg2[%c0_1, %c0_2], %3 {strides = array<i32>} : memref<2x1024xf32, #tpu.memory_space<vmem>>, vector<2x1024xf32>,
    return
  }
  func.func @transform_0(%arg0: i32) -> (i32, i32) {
    %c0_i32 = arith.constant 0 : i32
    %c0_i32_0 = arith.constant 0 : i32
    return %arg0, %c0_i32 : i32, i32
  }
  func.func @transform_1(%arg0: i32) -> (i32, i32) {
    %c0_i32 = arith.constant 0 : i32
    %c0_i32_0 = arith.constant 0 : i32
    return %arg0, %c0_i32 : i32, i32
  }
}

</mosaic_0001>

<bundles_post_ra>
// kernel: resblock_forward.1
= control target key start
LH: loop header
LB: loop body
LE: loop exit
PB: predicated region body
PF: predicated region fallthrough
CT: control target
= control target key end

     0   :  { %s42_s0 = inlined_call_operand.vmem [shape: f32[2,1024], index: 0, kind: input, shape index: {}]   ;;  %s43_s1 = inlined_call_operand.vmem [shape: f32[2,1024], index: 1, kind: output, shape index: {}]  }
   0x1   :  { %v8_v0 = vld [vmem:[%s42_s0] sm:$0xff]  ;;  %v9_v1 = vld [vmem:[%s42_s0 + $0x8] sm:$0xff] }
   0x2   :  { %v10_v2 = vmax.f32 %v8_v0, 0.0  ;;  %v11_v3 = vmax.f32 %v9_v1, 0.0 }
   0x4   :  { %v12_v4 = vadd.f32 %v10_v2, %v8_v0  ;;  %v13_v5 = vadd.f32 %v11_v3, %v9_v1 }
   0x6   :  { %14 = vst [vmem:[%s43_s1] sm:$0xff] %v12_v4  ;;  %15 = vst [vmem:[%s43_s1 + $0x8] sm:$0xff] %v13_v5 }

</bundles_post_ra>
